<compile_context>
chip_gen: v5e
topology: v5e:2x2
jax: 0.10.0
libtpu: 0.0.40
codegen_flags: <defaults>
</compile_context>

<pallas_src>
import functools

import jax
import jax.numpy as jnp
from jax.experimental import pallas as pl
from jax.experimental.pallas import tpu as pltpu

BN_EPS = 1e-5
LANE = 128
# Conservative cap so the VMEM-resident activation buffer also fits v7x's
# 64 MiB physical VMEM with room left for weights and double-buffered tiles.
ACT_VMEM_BUDGET_BYTES = 48 * 1024 * 1024


def _round_up(x, m):
    return (x + m - 1) // m * m


def _apply_act(z, act_fun):
    """Static (trace-time) activation selector, usable in-kernel and on host."""
    if act_fun == "ReLu":
        return jnp.maximum(z, 0.0)
    elif act_fun == "eLu":
        return jnp.where(z > 0.0, z, jnp.exp(jnp.minimum(z, 0.0)) - 1.0)
    elif act_fun == "tanh":
        return jnp.tanh(z)
    raise ValueError(f"unknown activation: {act_fun}")


def _pick_tile_n(n):
    """Divisor-aware row-tile pick: minimize zero-row padding, prefer big tiles."""
    if n <= 512:
        return _round_up(n, 16)
    candidates = (512, 256, 128)
    scored = sorted((_round_up(n, c) - n, -c, c) for c in candidates)
    return scored[0][2]


def _gin_stack_kernel(x_ref, w0_ref, wr_ref, gamma_ref, beta_ref, o_ref,
                      act_ref, sum_ref, sq_ref, scale_ref, shift_ref,
                      *, n_valid, n_pad, tile_n, n_layers, act_fun):
    s = pl.program_id(0)          # layer step: 0..n_layers (last = finalize only)
    t = pl.program_id(1)          # row (node) tile
    row0 = pl.multiple_of(t * tile_n, tile_n)
    rows = pl.ds(row0, tile_n)
    inv_n = jnp.float32(1.0 / n_valid)

    # ---- Once per layer step (t == 0): finalize the previous layer's BN ----
    # affine (scale = gamma * rsqrt(var + eps), shift = beta - mean * scale)
    # and reset the statistics accumulators for this step's matmul outputs.
    @pl.when(t == 0)
    def _per_step_setup():
        @pl.when(s >= 1)
        def _finalize_prev_layer_bn():
            mean = sum_ref[...] * inv_n
            var = jnp.maximum(sq_ref[...] * inv_n - mean * mean, 0.0)
            scale = gamma_ref[0] * jax.lax.rsqrt(var + BN_EPS)
            scale_ref[...] = scale
            shift_ref[...] = beta_ref[0] - mean * scale

        sum_ref[...] = jnp.zeros_like(sum_ref)
        sq_ref[...] = jnp.zeros_like(sq_ref)

    def _bn_act(y):
        # Previous layer's BN + activation as a single FMA + activation.
        return _apply_act(scale_ref[...] * y + shift_ref[...], act_fun)

    def _accumulate(y):
        sum_ref[...] += jnp.sum(y, axis=0, keepdims=True)
        sq_ref[...] += jnp.sum(y * y, axis=0, keepdims=True)

    def _accumulate_stats(y, rows_may_be_padded):
        if rows_may_be_padded and n_pad > n_valid:
            # Only the single ragged last tile pays for the row mask.
            is_full_tile = row0 + tile_n <= n_valid

            @pl.when(is_full_tile)
            def _():
                _accumulate(y)

            @pl.when(jnp.logical_not(is_full_tile))
            def _():
                ridx = row0 + jax.lax.broadcasted_iota(jnp.int32, y.shape, 0)
                _accumulate(jnp.where(ridx < n_valid, y, 0.0))
        else:
            _accumulate(y)

    # ---- Layer 0: read the padded bf16 input block directly (no seed copy).
    # Padded rows/cols of x are zero, so stats need no masking here.
    @pl.when(s == 0)
    def _layer0_matmul():
        y = jnp.dot(x_ref[...], w0_ref[...],
                    preferred_element_type=jnp.float32)
        act_ref[rows, :] = y
        _accumulate_stats(y, rows_may_be_padded=False)

    # ---- Hidden layers 1..n_layers-1: apply previous layer's BN affine +
    # activation on the fly, then matmul with this layer's weight.
    @pl.when((s >= 1) & (s < n_layers))
    def _hidden_layer_matmul():
        h = _bn_act(act_ref[rows, :])
        y = jnp.dot(h.astype(jnp.bfloat16), wr_ref[0],
                    preferred_element_type=jnp.float32)
        act_ref[rows, :] = y
        # Padded rows of h are act(shift) != 0, so garbage rows exist in y;
        # they only matter for the statistics, which are masked (gated).
        _accumulate_stats(y, rows_may_be_padded=True)

    # ---- Final step: BN + activation of the last layer, write the output.
    @pl.when(s == n_layers)
    def _final_bn_act():
        o_ref[...] = _bn_act(act_ref[rows, :]).astype(o_ref.dtype)


def gin_mlps_forward(h, params, act_fun="ReLu"):
    """Fused forward pass of the whole GIN MLP stack (train-mode BatchNorm)."""
    n, d_in = h.shape
    n_layers = len(params)
    d_hid = params[0][0].shape[1]

    # Lane-dense per-layer padding: features -> multiple of 128.
    k0_pad = _round_up(d_in, LANE)
    d_pad = _round_up(d_hid, LANE)
    tile_n = _pick_tile_n(n)
    n_pad = _round_up(n, tile_n)
    n_tiles = n_pad // tile_n

    act_bytes = n_pad * d_pad * 4
    if act_bytes > ACT_VMEM_BUDGET_BYTES:
        # TODO(synk): HBM-resident activation buffer (memory_space=pl.ANY +
        # pltpu.emit_pipeline over row tiles per layer) for graphs whose
        # activations exceed the v7x-safe VMEM budget.
        raise ValueError(
            f"activation buffer needs {act_bytes} B of VMEM, budget is "
            f"{ACT_VMEM_BUDGET_BYTES} B; reduce batch or add the HBM fallback")

    # ---- Host-side packing (bf16 matmul operands; BN params stay f32). ----
    x = jnp.zeros((n_pad, k0_pad), jnp.bfloat16).at[:n, :d_in].set(
        h.astype(jnp.bfloat16))

    w0 = jnp.zeros((k0_pad, d_pad), jnp.bfloat16).at[:d_in, :d_hid].set(
        params[0][0].astype(jnp.bfloat16))

    n_rest = max(n_layers - 1, 1)
    wr = jnp.zeros((n_rest, d_pad, d_pad), jnp.bfloat16)
    for i in range(1, n_layers):
        w = params[i][0]
        wr = wr.at[i - 1, :w.shape[0], :w.shape[1]].set(w.astype(jnp.bfloat16))

    g = jnp.zeros((n_layers, 1, d_pad), jnp.float32)
    b = jnp.zeros((n_layers, 1, d_pad), jnp.float32)
    for i, (_w, _bias, gamma, beta) in enumerate(params):
        # Linear bias intentionally dropped: cancels under train-mode BN.
        g = g.at[i, 0, :gamma.shape[0]].set(gamma.astype(jnp.float32))
        b = b.at[i, 0, :beta.shape[0]].set(beta.astype(jnp.float32))

    # ---- Explicit scoped-VMEM limit sized from the resident buffers. ----
    dbl = 2  # Pallas double-buffers pipelined blocks
    vmem_bytes = (
        act_bytes                              # activation scratch (f32)
        + 4 * 8 * d_pad * 4                    # sum / sq / scale / shift rows
        + dbl * tile_n * k0_pad * 2            # x tiles (bf16)
        + dbl * k0_pad * d_pad * 2             # first-layer weight (bf16)
        + dbl * d_pad * d_pad * 2              # hidden-layer weight tile (bf16)
        + dbl * 2 * 8 * d_pad * 4              # gamma / beta tiles
        + dbl * tile_n * d_pad * 4             # output tiles (f32)
        + (4 << 20)                            # headroom for compiler scratch
    )
    vmem_bytes = int(min(max(vmem_bytes, 32 << 20), 128 << 20))

    kernel = functools.partial(
        _gin_stack_kernel, n_valid=n, n_pad=n_pad, tile_n=tile_n,
        n_layers=n_layers, act_fun=act_fun)

    last_tile = n_tiles - 1
    last_rest = n_rest - 1

    out_padded = pl.pallas_call(
        kernel,
        out_shape=jax.ShapeDtypeStruct((n_pad, d_pad), jnp.float32),
        grid_spec=pltpu.PrefetchScalarGridSpec(
            num_scalar_prefetch=0,
            grid=(n_layers + 1, n_tiles),
            in_specs=[
                # x: only consumed at layer step 0; afterwards pin to the
                # last-used tile so no spurious re-DMA happens.
                pl.BlockSpec((tile_n, k0_pad),
                             lambda s, t: (jnp.where(s == 0, t, last_tile), 0)),
                # First-layer weight: VMEM-resident for the whole call.
                pl.BlockSpec((k0_pad, d_pad), lambda s, t: (0, 0)),
                # Hidden-layer weights: layer s uses wr[s-1]; re-fetched only
                # when the layer index changes (prefetched during step 0).
                pl.BlockSpec((1, d_pad, d_pad),
                             lambda s, t: (jnp.minimum(jnp.maximum(s - 1, 0),
                                                       last_rest), 0, 0)),
                # BN affine params of the layer being finalized (s - 1).
                pl.BlockSpec((1, 1, d_pad),
                             lambda s, t: (jnp.minimum(jnp.maximum(s - 1, 0),
                                                       n_layers - 1), 0, 0)),
                pl.BlockSpec((1, 1, d_pad),
                             lambda s, t: (jnp.minimum(jnp.maximum(s - 1, 0),
                                                       n_layers - 1), 0, 0)),
            ],
            # Output is written only on the final layer step; the index stays
            # pinned at block 0 until then, so the first HBM writeback happens
            # only after block 0 holds valid data.
            out_specs=pl.BlockSpec(
                (tile_n, d_pad),
                lambda s, t: (jnp.where(s == n_layers, t, 0), 0)),
            scratch_shapes=[
                pltpu.VMEM((n_pad, d_pad), jnp.float32),   # pre-BN activations
                pltpu.VMEM((1, d_pad), jnp.float32),       # sum(y) per feature
                pltpu.VMEM((1, d_pad), jnp.float32),       # sum(y^2) per feature
                pltpu.VMEM((1, d_pad), jnp.float32),       # BN scale
                pltpu.VMEM((1, d_pad), jnp.float32),       # BN shift
            ],
        ),
        compiler_params=pltpu.CompilerParams(
            # Both axes carry sequential dependencies (shared activation and
            # statistics scratch), so both are "arbitrary".
            # TODO(synk): v7x dual-TC split of the row-tile axis with per-core
            # partial sum/sq and a cross-core reduction (CMEM / VMEM_SHARED).
            dimension_semantics=("arbitrary", "arbitrary"),
            vmem_limit_bytes=vmem_bytes),
    )(x, w0, wr, g, b)

    return out_padded[:n, :d_hid]


def gin_mlps_reference(h, params, act_fun="ReLu"):
    """Pure-JAX reference: train-mode BatchNorm (PyTorch centered variance),
    matmul operands cast to bf16 to model the kernel's MXU inputs, Linear bias
    dropped (cancels exactly under batch-mean subtraction)."""
    h = h.astype(jnp.float32)
    for (w, _bias, gamma, beta) in params:
        y = jnp.dot(h.astype(jnp.bfloat16), w.astype(jnp.bfloat16),
                    preferred_element_type=jnp.float32)
        mean = jnp.mean(y, axis=0, keepdims=True)
        var = jnp.mean((y - mean) ** 2, axis=0, keepdims=True)
        h = _apply_act(
            gamma * (y - mean) * jax.lax.rsqrt(var + BN_EPS) + beta, act_fun)
    return h


def init_gin_mlps_params(key, num_slp_layers, mlp_input_dim, mlp_hid_dim,
                         bias=True):
    """Deterministic parameter init matching the PyTorch module's shapes.
    (Weights stored as (d_in, d_out) == W.T of nn.Linear.)"""
    params = []
    for i in range(num_slp_layers):
        d_in = mlp_input_dim if i == 0 else mlp_hid_dim
        d_out = mlp_hid_dim
        key, kw, kb, kg, kbt = jax.random.split(key, 5)
        bound = 1.0 / float(d_in) ** 0.5
        w = jax.random.uniform(kw, (d_in, d_out), jnp.float32, -bound, bound)
        if bias:
            b = jax.random.uniform(kb, (d_out,), jnp.float32, -bound, bound)
        else:
            b = jnp.zeros((d_out,), jnp.float32)
        # PyTorch BatchNorm1d default is gamma=1, beta=0; perturb here so the
        # test exercises a non-trivial BN affine.
        gamma = 1.0 + 0.1 * jax.random.normal(kg, (d_out,), jnp.float32)
        beta = 0.1 * jax.random.normal(kbt, (d_out,), jnp.float32)
        params.append((w, b, gamma, beta))
    return params


if __name__ == "__main__":
    key = jax.random.PRNGKey(0)

    configs = [
        # layers, d_in, d_hid, batch, activation
        dict(num_slp_layers=3, mlp_input_dim=16, mlp_hid_dim=32, batch=10,
             act_fun="ReLu"),
        dict(num_slp_layers=1, mlp_input_dim=16, mlp_hid_dim=32, batch=10,
             act_fun="tanh"),
        # multi-tile row axis + ragged last tile (exercises masked stats path)
        dict(num_slp_layers=2, mlp_input_dim=48, mlp_hid_dim=64, batch=600,
             act_fun="eLu"),
    ]

    for cfg in configs:
        key, kx, kp = jax.random.split(key, 3)
        h = jax.random.normal(kx, (cfg["batch"], cfg["mlp_input_dim"]),
                              jnp.float32)
        params = init_gin_mlps_params(kp, cfg["num_slp_layers"],
                                      cfg["mlp_input_dim"], cfg["mlp_hid_dim"],
                                      bias=True)

        fwd = jax.jit(functools.partial(gin_mlps_forward,
                                        act_fun=cfg["act_fun"]))
        out = fwd(h, params)
        jax.block_until_ready(out)

        assert out.shape == (cfg["batch"], cfg["mlp_hid_dim"])
        assert out.dtype == jnp.float32

        ref = gin_mlps_reference(h, params, act_fun=cfg["act_fun"])
        max_err = float(jnp.max(jnp.abs(out - ref)))
        assert bool(jnp.allclose(out, ref, atol=3e-3, rtol=3e-3)), (cfg, max_err)

    print("KERNEL_OK")
</pallas_src>

<mosaic_0001>
module attributes {stable_mosaic.version = 11 : i64} {
  func.func @_gin_stack_kernel(%arg0: i32, %arg1: i32, %arg2: memref<16x128xbf16, #tpu.memory_space<vmem>>, %arg3: memref<128x128xbf16, #tpu.memory_space<vmem>>, %arg4: memref<1x128x128xbf16, #tpu.memory_space<vmem>>, %arg5: memref<1x1x128xf32, #tpu.memory_space<vmem>>, %arg6: memref<1x1x128xf32, #tpu.memory_space<vmem>>, %arg7: memref<16x128xf32, #tpu.memory_space<vmem>>, %arg8: memref<16x128xf32, #tpu.memory_space<vmem>>, %arg9: memref<1x128xf32, #tpu.memory_space<vmem>>, %arg10: memref<1x128xf32, #tpu.memory_space<vmem>>, %arg11: memref<1x128xf32, #tpu.memory_space<vmem>>, %arg12: memref<1x128xf32, #tpu.memory_space<vmem>>) attributes {dimension_semantics = [#tpu.dimension_semantics<arbitrary>, #tpu.dimension_semantics<arbitrary>], iteration_bounds = array<i64: 4, 1>, scalar_prefetch = 0 : i64, scratch_operands = 5 : i64, tpu.core_type = #tpu.core_type<tc>, window_params = [{transform_indices = @transform_0, window_bounds = array<i64: 16, 128>}, {pipeline_mode = #tpu.pipeline_mode<synchronous>, transform_indices = @transform_1, window_bounds = array<i64: 128, 128>}, {transform_indices = @transform_2, window_bounds = array<i64: 1, 128, 128>}, {transform_indices = @transform_3, window_bounds = array<i64: 1, 1, 128>}, {transform_indices = @transform_4, window_bounds = array<i64: 1, 1, 128>}, {transform_indices = @transform_5, window_bounds = array<i64: 16, 128>}]} {
    %c16_i32 = arith.constant 16 : i32
    %0 = arith.muli %arg1, %c16_i32 : i32
    %1 = tpu.assume_multiple %0, 16 : i32
    %c0_i32 = arith.constant 0 : i32
    %2 = arith.cmpi eq, %arg1, %c0_i32 : i32
    %3 = arith.extui %2 : i1 to i32
    %cst = arith.constant 1.000000e-01 : f32
    %c0_i32_0 = arith.constant 0 : i32
    %4 = arith.cmpi ne, %3, %c0_i32_0 : i32
    scf.if %4 {
      %c1_i32_6 = arith.constant 1 : i32
      %16 = arith.cmpi sge, %arg0, %c1_i32_6 : i32
      %17 = arith.extui %16 : i1 to i32
      %c0_i32_7 = arith.constant 0 : i32
      %18 = arith.cmpi ne, %17, %c0_i32_7 : i32
      scf.if %18 {
        %c0_13 = arith.constant 0 : index
        %c0_14 = arith.constant 0 : index
        %23 = vector.load %arg9[%c0_13, %c0_14] : memref<1x128xf32, #tpu.memory_space<vmem>>, vector<1x128xf32>
        %24 = vector.broadcast %cst : f32 to vector<1x128xf32>
        %25 = arith.mulf %23, %24 : vector<1x128xf32>
        %c0_15 = arith.constant 0 : index
        %c0_16 = arith.constant 0 : index
        %26 = vector.load %arg10[%c0_15, %c0_16] : memref<1x128xf32, #tpu.memory_space<vmem>>, vector<1x128xf32>
        %27 = vector.broadcast %cst : f32 to vector<1x128xf32>
        %28 = arith.mulf %26, %27 : vector<1x128xf32>
        %29 = arith.mulf %25, %25 : vector<1x128xf32>
        %30 = arith.subf %28, %29 : vector<1x128xf32>
        %cst_17 = arith.constant 0.000000e+00 : f32
        %31 = vector.broadcast %cst_17 : f32 to vector<1x128xf32>
        %32 = arith.maximumf %30, %31 : vector<1x128xf32>
        %c0_18 = arith.constant 0 : index
        %c0_19 = arith.constant 0 : index
        %c0_20 = arith.constant 0 : index
        %33 = vector.load %arg5[%c0_18, %c0_19, %c0_20] : memref<1x1x128xf32, #tpu.memory_space<vmem>>, vector<1x1x128xf32>
        %34 = vector.shape_cast %33 : vector<1x1x128xf32> to vector<1x128xf32>
        %cst_21 = arith.constant 9.99999974E-6 : f32
        %35 = vector.broadcast %cst_21 : f32 to vector<1x128xf32>
        %36 = arith.addf %32, %35 : vector<1x128xf32>
        %37 = math.rsqrt %36 : vector<1x128xf32>
        %38 = arith.mulf %34, %37 : vector<1x128xf32>
        %c0_22 = arith.constant 0 : index
        %c0_23 = arith.constant 0 : index
        %39 = vector.load %arg11[%c0_22, %c0_23] : memref<1x128xf32, #tpu.memory_space<vmem>>, vector<1x128xf32>
        tpu.vector_store %arg11[%c0_22, %c0_23], %38 {strides = array<i32>} : memref<1x128xf32, #tpu.memory_space<vmem>>, vector<1x128xf32>,
        %c0_24 = arith.constant 0 : index
        %c0_25 = arith.constant 0 : index
        %c0_26 = arith.constant 0 : index
        %40 = vector.load %arg6[%c0_24, %c0_25, %c0_26] : memref<1x1x128xf32, #tpu.memory_space<vmem>>, vector<1x1x128xf32>
        %41 = vector.shape_cast %40 : vector<1x1x128xf32> to vector<1x128xf32>
        %42 = arith.mulf %25, %38 : vector<1x128xf32>
        %43 = arith.subf %41, %42 : vector<1x128xf32>
        %c0_27 = arith.constant 0 : index
        %c0_28 = arith.constant 0 : index
        %44 = vector.load %arg12[%c0_27, %c0_28] : memref<1x128xf32, #tpu.memory_space<vmem>>, vector<1x128xf32>
        tpu.vector_store %arg12[%c0_27, %c0_28], %43 {strides = array<i32>} : memref<1x128xf32, #tpu.memory_space<vmem>>, vector<1x128xf32>,
      } else {
      }
      %cst_8 = arith.constant 0.000000e+00 : f32
      %19 = vector.broadcast %cst_8 : f32 to vector<1x128xf32>
      %c0 = arith.constant 0 : index
      %c0_9 = arith.constant 0 : index
      %20 = vector.load %arg9[%c0, %c0_9] : memref<1x128xf32, #tpu.memory_space<vmem>>, vector<1x128xf32>
      tpu.vector_store %arg9[%c0, %c0_9], %19 {strides = array<i32>} : memref<1x128xf32, #tpu.memory_space<vmem>>, vector<1x128xf32>,
      %cst_10 = arith.constant 0.000000e+00 : f32
      %21 = vector.broadcast %cst_10 : f32 to vector<1x128xf32>
      %c0_11 = arith.constant 0 : index
      %c0_12 = arith.constant 0 : index
      %22 = vector.load %arg10[%c0_11, %c0_12] : memref<1x128xf32, #tpu.memory_space<vmem>>, vector<1x128xf32>
      tpu.vector_store %arg10[%c0_11, %c0_12], %21 {strides = array<i32>} : memref<1x128xf32, #tpu.memory_space<vmem>>, vector<1x128xf32>,
    } else {
    }
    %c0_i32_1 = arith.constant 0 : i32
    %5 = arith.cmpi eq, %arg0, %c0_i32_1 : i32
    %6 = arith.extui %5 : i1 to i32
    %c0_i32_2 = arith.constant 0 : i32
    %7 = arith.cmpi ne, %6, %c0_i32_2 : i32
    scf.if %7 {
      %c0 = arith.constant 0 : index
      %c0_6 = arith.constant 0 : index
      %16 = vector.load %arg2[%c0, %c0_6] : memref<16x128xbf16, #tpu.memory_space<vmem>>, vector<16x128xbf16>
      %c0_7 = arith.constant 0 : index
      %c0_8 = arith.constant 0 : index
      %17 = vector.load %arg3[%c0_7, %c0_8] : memref<128x128xbf16, #tpu.memory_space<vmem>>, vector<128x128xbf16>
      %cst_9 = arith.constant dense<0.000000e+00> : vector<16x128xf32>
      %18 = tpu.matmul %16, %17, %cst_9 {dimension_numbers = #tpu.dot_dimension_numbers<[1], [0], [0], [1], [0, 0, 1, 1], [], []>} : vector<16x128xbf16>, vector<128x128xbf16>, vector<16x128xf32> -> vector<16x128xf32>
      %19 = arith.index_cast %1 : i32 to index
      %c0_10 = arith.constant 0 : index
      %20 = vector.load %arg8[%19, %c0_10] : memref<16x128xf32, #tpu.memory_space<vmem>>, vector<16x128xf32>
      tpu.vector_store %arg8[%19, %c0_10], %18 {strides = array<i32>} : memref<16x128xf32, #tpu.memory_space<vmem>>, vector<16x128xf32>,
      %c0_11 = arith.constant 0 : index
      %c0_12 = arith.constant 0 : index
      %21 = vector.load %arg9[%c0_11, %c0_12] : memref<1x128xf32, #tpu.memory_space<vmem>>, vector<1x128xf32>
      %cst_13 = arith.constant dense<0.000000e+00> : vector<128xf32>
      %22 = vector.multi_reduction <add>, %18, %cst_13 [0] : vector<16x128xf32> to vector<128xf32>
      %23 = vector.shape_cast %22 : vector<128xf32> to vector<1x128xf32>
      %24 = arith.addf %21, %23 : vector<1x128xf32>
      %c0_14 = arith.constant 0 : index
      %c0_15 = arith.constant 0 : index
      %25 = vector.load %arg9[%c0_14, %c0_15] : memref<1x128xf32, #tpu.memory_space<vmem>>, vector<1x128xf32>
      tpu.vector_store %arg9[%c0_14, %c0_15], %24 {strides = array<i32>} : memref<1x128xf32, #tpu.memory_space<vmem>>, vector<1x128xf32>,
      %c0_16 = arith.constant 0 : index
      %c0_17 = arith.constant 0 : index
      %26 = vector.load %arg10[%c0_16, %c0_17] : memref<1x128xf32, #tpu.memory_space<vmem>>, vector<1x128xf32>
      %27 = arith.mulf %18, %18 : vector<16x128xf32>
      %cst_18 = arith.constant dense<0.000000e+00> : vector<128xf32>
      %28 = vector.multi_reduction <add>, %27, %cst_18 [0] : vector<16x128xf32> to vector<128xf32>
      %29 = vector.shape_cast %28 : vector<128xf32> to vector<1x128xf32>
      %30 = arith.addf %26, %29 : vector<1x128xf32>
      %c0_19 = arith.constant 0 : index
      %c0_20 = arith.constant 0 : index
      %31 = vector.load %arg10[%c0_19, %c0_20] : memref<1x128xf32, #tpu.memory_space<vmem>>, vector<1x128xf32>
      tpu.vector_store %arg10[%c0_19, %c0_20], %30 {strides = array<i32>} : memref<1x128xf32, #tpu.memory_space<vmem>>, vector<1x128xf32>,
    } else {
    }
    %c1_i32 = arith.constant 1 : i32
    %8 = arith.cmpi sge, %arg0, %c1_i32 : i32
    %c3_i32 = arith.constant 3 : i32
    %9 = arith.cmpi slt, %arg0, %c3_i32 : i32
    %10 = arith.andi %8, %9 : i1
    %11 = arith.extui %10 : i1 to i32
    %c0_i32_3 = arith.constant 0 : i32
    %12 = arith.cmpi ne, %11, %c0_i32_3 : i32
    scf.if %12 {
      %16 = arith.index_cast %1 : i32 to index
      %c0 = arith.constant 0 : index
      %17 = vector.load %arg8[%16, %c0] : memref<16x128xf32, #tpu.memory_space<vmem>>, vector<16x128xf32>
      %c0_6 = arith.constant 0 : index
      %c0_7 = arith.constant 0 : index
      %18 = vector.load %arg11[%c0_6, %c0_7] : memref<1x128xf32, #tpu.memory_space<vmem>>, vector<1x128xf32>
      %19 = vector.broadcast %18 : vector<1x128xf32> to vector<16x128xf32>
      %20 = arith.mulf %19, %17 : vector<16x128xf32>
      %c0_8 = arith.constant 0 : index
      %c0_9 = arith.constant 0 : index
      %21 = vector.load %arg12[%c0_8, %c0_9] : memref<1x128xf32, #tpu.memory_space<vmem>>, vector<1x128xf32>
      %22 = vector.broadcast %21 : vector<1x128xf32> to vector<16x128xf32>
      %23 = arith.addf %20, %22 : vector<16x128xf32>
      %cst_10 = arith.constant 0.000000e+00 : f32
      %24 = vector.broadcast %cst_10 : f32 to vector<16x128xf32>
      %25 = arith.maximumf %23, %24 : vector<16x128xf32>
      %26 = arith.truncf %25 : vector<16x128xf32> to vector<16x128xbf16>
      %c0_11 = arith.constant 0 : index
      %c0_12 = arith.constant 0 : index
      %c0_13 = arith.constant 0 : index
      %27 = vector.load %arg4[%c0_11, %c0_12, %c0_13] : memref<1x128x128xbf16, #tpu.memory_space<vmem>>, vector<1x128x128xbf16>
      %28 = vector.shape_cast %27 : vector<1x128x128xbf16> to vector<128x128xbf16>
      %cst_14 = arith.constant dense<0.000000e+00> : vector<16x128xf32>
      %29 = tpu.matmul %26, %28, %cst_14 {dimension_numbers = #tpu.dot_dimension_numbers<[1], [0], [0], [1], [0, 0, 1, 1], [], []>} : vector<16x128xbf16>, vector<128x128xbf16>, vector<16x128xf32> -> vector<16x128xf32>
      %30 = arith.index_cast %1 : i32 to index
      %c0_15 = arith.constant 0 : index
      %31 = vector.load %arg8[%30, %c0_15] : memref<16x128xf32, #tpu.memory_space<vmem>>, vector<16x128xf32>
      tpu.vector_store %arg8[%30, %c0_15], %29 {strides = array<i32>} : memref<16x128xf32, #tpu.memory_space<vmem>>, vector<16x128xf32>,
      %c16_i32_16 = arith.constant 16 : i32
      %32 = arith.addi %1, %c16_i32_16 : i32
      %c10_i32 = arith.constant 10 : i32
      %33 = arith.cmpi sle, %32, %c10_i32 : i32
      %34 = arith.extui %33 : i1 to i32
      %c0_i32_17 = arith.constant 0 : i32
      %35 = arith.cmpi ne, %34, %c0_i32_17 : i32
      scf.if %35 {
        %c0_19 = arith.constant 0 : index
        %c0_20 = arith.constant 0 : index
        %39 = vector.load %arg9[%c0_19, %c0_20] : memref<1x128xf32, #tpu.memory_space<vmem>>, vector<1x128xf32>
        %cst_21 = arith.constant dense<0.000000e+00> : vector<128xf32>
        %40 = vector.multi_reduction <add>, %29, %cst_21 [0] : vector<16x128xf32> to vector<128xf32>
        %41 = vector.shape_cast %40 : vector<128xf32> to vector<1x128xf32>
        %42 = arith.addf %39, %41 : vector<1x128xf32>
        %c0_22 = arith.constant 0 : index
        %c0_23 = arith.constant 0 : index
        %43 = vector.load %arg9[%c0_22, %c0_23] : memref<1x128xf32, #tpu.memory_space<vmem>>, vector<1x128xf32>
        tpu.vector_store %arg9[%c0_22, %c0_23], %42 {strides = array<i32>} : memref<1x128xf32, #tpu.memory_space<vmem>>, vector<1x128xf32>,
        %c0_24 = arith.constant 0 : index
        %c0_25 = arith.constant 0 : index
        %44 = vector.load %arg10[%c0_24, %c0_25] : memref<1x128xf32, #tpu.memory_space<vmem>>, vector<1x128xf32>
        %45 = arith.mulf %29, %29 : vector<16x128xf32>
        %cst_26 = arith.constant dense<0.000000e+00> : vector<128xf32>
        %46 = vector.multi_reduction <add>, %45, %cst_26 [0] : vector<16x128xf32> to vector<128xf32>
        %47 = vector.shape_cast %46 : vector<128xf32> to vector<1x128xf32>
        %48 = arith.addf %44, %47 : vector<1x128xf32>
        %c0_27 = arith.constant 0 : index
        %c0_28 = arith.constant 0 : index
        %49 = vector.load %arg10[%c0_27, %c0_28] : memref<1x128xf32, #tpu.memory_space<vmem>>, vector<1x128xf32>
        tpu.vector_store %arg10[%c0_27, %c0_28], %48 {strides = array<i32>} : memref<1x128xf32, #tpu.memory_space<vmem>>, vector<1x128xf32>,
      } else {
      }
      %true = arith.constant true
      %36 = arith.xori %33, %true : i1
      %37 = arith.extui %36 : i1 to i32
      %c0_i32_18 = arith.constant 0 : i32
      %38 = arith.cmpi ne, %37, %c0_i32_18 : i32
      scf.if %38 {
        %39 = tpu.iota {dimensions = array<i32: 0>} : vector<16x128xi32>
        %40 = vector.broadcast %1 : i32 to vector<16x128xi32>
        %41 = arith.addi %40, %39 : vector<16x128xi32>
        %c10_i32_19 = arith.constant 10 : i32
        %42 = vector.broadcast %c10_i32_19 : i32 to vector<16x128xi32>
        %43 = arith.cmpi slt, %41, %42 : vector<16x128xi32>
        %cst_20 = arith.constant 0.000000e+00 : f32
        %44 = vector.broadcast %cst_20 : f32 to vector<16x128xf32>
        %45 = arith.select %43, %29, %44 : vector<16x128xi1>, vector<16x128xf32>
        %c0_21 = arith.constant 0 : index
        %c0_22 = arith.constant 0 : index
        %46 = vector.load %arg9[%c0_21, %c0_22] : memref<1x128xf32, #tpu.memory_space<vmem>>, vector<1x128xf32>
        %cst_23 = arith.constant dense<0.000000e+00> : vector<128xf32>
        %47 = vector.multi_reduction <add>, %45, %cst_23 [0] : vector<16x128xf32> to vector<128xf32>
        %48 = vector.shape_cast %47 : vector<128xf32> to vector<1x128xf32>
        %49 = arith.addf %46, %48 : vector<1x128xf32>
        %c0_24 = arith.constant 0 : index
        %c0_25 = arith.constant 0 : index
        %50 = vector.load %arg9[%c0_24, %c0_25] : memref<1x128xf32, #tpu.memory_space<vmem>>, vector<1x128xf32>
        tpu.vector_store %arg9[%c0_24, %c0_25], %49 {strides = array<i32>} : memref<1x128xf32, #tpu.memory_space<vmem>>, vector<1x128xf32>,
        %c0_26 = arith.constant 0 : index
        %c0_27 = arith.constant 0 : index
        %51 = vector.load %arg10[%c0_26, %c0_27] : memref<1x128xf32, #tpu.memory_space<vmem>>, vector<1x128xf32>
        %52 = arith.mulf %45, %45 : vector<16x128xf32>
        %cst_28 = arith.constant dense<0.000000e+00> : vector<128xf32>
        %53 = vector.multi_reduction <add>, %52, %cst_28 [0] : vector<16x128xf32> to vector<128xf32>
        %54 = vector.shape_cast %53 : vector<128xf32> to vector<1x128xf32>
        %55 = arith.addf %51, %54 : vector<1x128xf32>
        %c0_29 = arith.constant 0 : index
        %c0_30 = arith.constant 0 : index
        %56 = vector.load %arg10[%c0_29, %c0_30] : memref<1x128xf32, #tpu.memory_space<vmem>>, vector<1x128xf32>
        tpu.vector_store %arg10[%c0_29, %c0_30], %55 {strides = array<i32>} : memref<1x128xf32, #tpu.memory_space<vmem>>, vector<1x128xf32>,
      } else {
      }
    } else {
    }
    %c3_i32_4 = arith.constant 3 : i32
    %13 = arith.cmpi eq, %arg0, %c3_i32_4 : i32
    %14 = arith.extui %13 : i1 to i32
    %c0_i32_5 = arith.constant 0 : i32
    %15 = arith.cmpi ne, %14, %c0_i32_5 : i32
    scf.if %15 {
      %16 = arith.index_cast %1 : i32 to index
      %c0 = arith.constant 0 : index
      %17 = vector.load %arg8[%16, %c0] : memref<16x128xf32, #tpu.memory_space<vmem>>, vector<16x128xf32>
      %c0_6 = arith.constant 0 : index
      %c0_7 = arith.constant 0 : index
      %18 = vector.load %arg11[%c0_6, %c0_7] : memref<1x128xf32, #tpu.memory_space<vmem>>, vector<1x128xf32>
      %19 = vector.broadcast %18 : vector<1x128xf32> to vector<16x128xf32>
      %20 = arith.mulf %19, %17 : vector<16x128xf32>
      %c0_8 = arith.constant 0 : index
      %c0_9 = arith.constant 0 : index
      %21 = vector.load %arg12[%c0_8, %c0_9] : memref<1x128xf32, #tpu.memory_space<vmem>>, vector<1x128xf32>
      %22 = vector.broadcast %21 : vector<1x128xf32> to vector<16x128xf32>
      %23 = arith.addf %20, %22 : vector<16x128xf32>
      %cst_10 = arith.constant 0.000000e+00 : f32
      %24 = vector.broadcast %cst_10 : f32 to vector<16x128xf32>
      %25 = arith.maximumf %23, %24 : vector<16x128xf32>
      %c0_11 = arith.constant 0 : index
      %c0_12 = arith.constant 0 : index
      %26 = vector.load %arg7[%c0_11, %c0_12] : memref<16x128xf32, #tpu.memory_space<vmem>>, vector<16x128xf32>
      tpu.vector_store %arg7[%c0_11, %c0_12], %25 {strides = array<i32>} : memref<16x128xf32, #tpu.memory_space<vmem>>, vector<16x128xf32>,
    } else {
    }
    return
  }
  func.func @transform_0(%arg0: i32, %arg1: i32) -> (i32, i32) {
    %c0_i32 = arith.constant 0 : i32
    %0 = arith.cmpi eq, %arg0, %c0_i32 : i32
    %c0_i32_0 = arith.constant 0 : i32
    %1 = arith.select %0, %arg1, %c0_i32_0 : i32
    %c0_i32_1 = arith.constant 0 : i32
    %c0_i32_2 = arith.constant 0 : i32
    return %1, %c0_i32_1 : i32, i32
  }
  func.func @transform_1(%arg0: i32, %arg1: i32) -> (i32, i32) {
    %c0_i32 = arith.constant 0 : i32
    %c0_i32_0 = arith.constant 0 : i32
    %c0_i32_1 = arith.constant 0 : i32
    return %c0_i32, %c0_i32_0 : i32, i32
  }
  func.func @transform_2(%arg0: i32, %arg1: i32) -> (i32, i32, i32) {
    %c1_i32 = arith.constant 1 : i32
    %0 = arith.subi %arg0, %c1_i32 : i32
    %c0_i32 = arith.constant 0 : i32
    %1 = arith.maxsi %0, %c0_i32 : i32
    %c1_i32_0 = arith.constant 1 : i32
    %2 = arith.minsi %1, %c1_i32_0 : i32
    %c0_i32_1 = arith.constant 0 : i32
    %c0_i32_2 = arith.constant 0 : i32
    %c0_i32_3 = arith.constant 0 : i32
    return %2, %c0_i32_1, %c0_i32_2 : i32, i32, i32
  }
  func.func @transform_3(%arg0: i32, %arg1: i32) -> (i32, i32, i32) {
    %c1_i32 = arith.constant 1 : i32
    %0 = arith.subi %arg0, %c1_i32 : i32
    %c0_i32 = arith.constant 0 : i32
    %1 = arith.maxsi %0, %c0_i32 : i32
    %c2_i32 = arith.constant 2 : i32
    %2 = arith.minsi %1, %c2_i32 : i32
    %c0_i32_0 = arith.constant 0 : i32
    %c0_i32_1 = arith.constant 0 : i32
    %c0_i32_2 = arith.constant 0 : i32
    return %2, %c0_i32_0, %c0_i32_1 : i32, i32, i32
  }
  func.func @transform_4(%arg0: i32, %arg1: i32) -> (i32, i32, i32) {
    %c1_i32 = arith.constant 1 : i32
    %0 = arith.subi %arg0, %c1_i32 : i32
    %c0_i32 = arith.constant 0 : i32
    %1 = arith.maxsi %0, %c0_i32 : i32
    %c2_i32 = arith.constant 2 : i32
    %2 = arith.minsi %1, %c2_i32 : i32
    %c0_i32_0 = arith.constant 0 : i32
    %c0_i32_1 = arith.constant 0 : i32
    %c0_i32_2 = arith.constant 0 : i32
    return %2, %c0_i32_0, %c0_i32_1 : i32, i32, i32
  }
  func.func @transform_5(%arg0: i32, %arg1: i32) -> (i32, i32) {
    %c3_i32 = arith.constant 3 : i32
    %0 = arith.cmpi eq, %arg0, %c3_i32 : i32
    %c0_i32 = arith.constant 0 : i32
    %1 = arith.select %0, %arg1, %c0_i32 : i32
    %c0_i32_0 = arith.constant 0 : i32
    %c0_i32_1 = arith.constant 0 : i32
    return %1, %c0_i32_0 : i32, i32
  }
}

</mosaic_0001>

<bundles_post_ra>
// kernel: gin_mlps_forward.1
= control target key start
LH: loop header
LB: loop body
LE: loop exit
PB: predicated region body
PF: predicated region fallthrough
CT: control target
= control target key end

     0   :  { %10 = vsyncpa [#allocation8], 0  ;;  %s1275_s0 = inlined_call_operand.vmem [shape: bf16[16,128], index: 0, kind: input, shape index: {}]   ;;  %s1276_s1 = inlined_call_operand.vmem [shape: bf16[128,128], index: 1, kind: input, shape index: {}]   ;;  %s1277_s2 = inlined_call_operand.vmem [shape: bf16[2,128,128], index: 2, kind: input, shape index: {}]   ;;  %s1278_s3 = inlined_call_operand.vmem [shape: f32[3,1,128], index: 3, kind: input, shape index: {}]   ;;  %s1279_s4 = inlined_call_operand.vmem [shape: f32[3,1,128], index: 4, kind: input, shape index: {}]   ;;  %s1280_s5 = inlined_call_operand.hbm [shape: f32[16,128], index: 5, kind: output, shape index: {}]  }
   0x1   :  { %12 = vsyncpa [#allocation8 + $0x1], 0  ;;  %s1184_s18 = smov 0   ;;  %s1186_s19 = smov 0  }
   0x2   :  { %s1188_s20 = smov 0  }
   0x3 LB: > { %s876_s21 = sadd.s32 4294967295, %s1148_s20   ;;  %s877_s22 = sadd.s32 4294967294, %s1148_s20   ;;  %s1148_s20 = sphi %s1188_s20, %s18_s20   ;;  %s1144_s19 = sphi %s1186_s19, %s1282_s19   ;;  %s1140_s18 = sphi %s1184_s18, %s1281_s18  }
   0x4   : > { %s30_s23 = sadd.s32 1, %s1144_s19  ;;  %p917_p0 = scmp.ge.s32.totalorder %s1148_s20, 1 }
   0x5   : > { %p32_p1 = scmp.ge.s32.totalorder %s30_s23, 4  ;;  %p301_p2 = scmp.lt.s32.totalorder %s1148_s20, 5 }
   0x7   : > { %s1284_s23 = smov (%p32_p1, %s30_s23), 0  ;;  %p302_p3 = pnand %p917_p0, %p301_p2 }
   0x8   : > { %s918_s24 = sadd.s32 (!%p302_p3), 4294967295, %s1140_s18  ;;  %p938_p9 = scmp.lt.s32.totalorder (!%p302_p3), %s1140_s18, 1 }
   0x9   : > { %305 = sbr.rel (%p302_p3) target bundleno = 466 (0x1d2), region = 40  ;;  %p368_p4 = scmp.gt.s32.totalorder (!%p302_p3), %s918_s24, 0 }
   0xa   : > { %p919_p5 = scmp.lt.s32.totalorder (!%p302_p3), %s918_s24, 1  ;;  %p927_p6 = scmp.lt.s32.totalorder (!%p302_p3), %s918_s24, 2 }
   0xe   : > { %s1286_s24 = smov (!%p368_p4, %s918_s24), 0 }
   0xf   : > { %s1026_s25 = scalar_select %p919_p5, %s1286_s24, 1 }
  0x10   : > { %s1288_s24 = smov (!%p927_p6, %s1286_s24), 2 }
  0x11   : > { %p372_p7 = scmp.lt.s32.totalorder %s1026_s25, 1  ;;  %p387_p8 = scmp.lt.s32.totalorder %s1288_s24, 2 }
  0x12   : > { %419 = sbr.rel (%p938_p9) target bundleno = 59 (0x3b), region = 48 }
  0x13   : > { %s1290_s25 = smov (!%p372_p7, %s1026_s25), 1  ;;  %s1292_s24 = smov (!%p387_p8, %s1288_s24), 2 }
  0x14   : > { %s1027_s26 = sshll.u32 %s1290_s25, 6  ;;  %s389_s7 = scalar_lea.vmem %s1278_s3, %s1292_s24 }
  0x15   : > { %s1210_s29 = scalar_lea.vmem %s1277_s2, %s1027_s26  ;;  %s402_s10 = scalar_lea.vmem %s1279_s4, %s1292_s24 }
  0x17   : > { %v420_v0 = vld [vmem:[#allocation3] sm:$0x1]  ;;  %v422_v1 = vld [vmem:[#allocation4] sm:$0x1]  ;;  %v427_v13 = vld [vmem:[%s389_s7] sm:$0x1] }
  0x18   : > { %v421_v2 = vmul.f32 0.1, %v420_v0  ;;  %v423_v3 = vmul.f32 0.1, %v422_v1  ;;  %v441_v17 = vld [vmem:[%s402_s10] sm:$0x1] }
  0x1a   : > { %v424_v4 = vmul.f32 %v421_v2, %v421_v2 }
  0x1c   : > { %v425_v5 = vsub.f32 %v423_v3, %v424_v4 }
  0x1e   : > { %v426_v6 = vmax.f32 %v425_v5, 0.0 }
  0x20   : > { %v428_v7 = vadd.f32 1e-05, %v426_v6 }
  0x22   : > { %1088 = vrsqrt.f32 %v428_v7  ;;  %vm435_vm0 = vweird.f32 %v428_v7 }
  0x28   : > { %v1089_v8 = vpop.eup %1088 }
  0x29   : > { %v430_v9 = vmul.f32 %v1089_v8, %v428_v7  ;;  %vm436_vm1 = vweird.f32 %v1089_v8 }
  0x2a   : > { %vm437_vm2 = vmor %vm435_vm0, %vm436_vm1 }
  0x2b   : > { %v431_v10 = vmul.f32 %v1089_v8, %v430_v9 }
  0x2d   : > { %v432_v11 = vmul.f32 0.5, %v431_v10 }
  0x2f   : > { %v433_v12 = vsub.f32 1.5, %v432_v11 }
  0x31   : > { %v434_v14 = vmul.f32 %v1089_v8, %v433_v12 }
  0x33   : > { %v438_v15 = vsel %vm437_vm2, %v1089_v8, %v434_v14 }
  0x34   : > { %v439_v16 = vmul.f32 %v438_v15, %v427_v13 }
  0x36   : > { %440 = vst [vmem:[#allocation5] sm:$0x1] %v439_v16  ;;  %v442_v18 = vmul.f32 %v439_v16, %v421_v2 }
  0x38   : > { %v443_v19 = vsub.f32 %v441_v17, %v442_v18 }
  0x3a   : > { %444 = vst [vmem:[#allocation6] sm:$0x1] %v443_v19 }
  0x3b PF: > { %v1150_v20 = vmov 0.0   ;;  %p939_p10 = scmp.ne.s32.totalorder %s1140_s18, 0 }
  0x3c   : > { %445 = vst [vmem:[#allocation3] sm:$0x1] %v1150_v20 }
  0x3d   : > { %446 = vst [vmem:[#allocation4] sm:$0x1] %v1150_v20  ;;  %450 = sbr.rel (%p939_p10) target bundleno = 251 (0xfb), region = 52 }
  0x42   : > { %v1040_v21 = vld [vmem:[%s1276_s1 + $0x38] sm:$0xff]  ;;  %v1039_v22 = vld [vmem:[%s1276_s1 + $0x30] sm:$0xff]  ;;  %v1038_v23 = vld [vmem:[%s1276_s1 + $0x28] sm:$0xff] }
  0x43   : > { %523 = vmatpush.bf16.msra.mxu0 %v1040_v21  ;;  %v1037_v24 = vld [vmem:[%s1276_s1 + $0x20] sm:$0xff]  ;;  %v1036_v25 = vld [vmem:[%s1276_s1 + $0x18] sm:$0xff]  ;;  %v1035_v26 = vld [vmem:[%s1276_s1 + $0x10] sm:$0xff] }
  0x44   : > { %v1034_v27 = vld [vmem:[%s1276_s1 + $0x8] sm:$0xff]  ;;  %v1033_v28 = vld [vmem:[%s1276_s1] sm:$0xff]  ;;  %v540_v45 = vld [vmem:[#allocation3] sm:$0x1] }
  0x45   : > { %v1032_v29 = vld [vmem:[%s1275_s0] sm:$0xff]  ;;  %v550_v48 = vld [vmem:[#allocation4] sm:$0x1] }
  0x47   : > { %524 = vmatpush.bf16.msra.mxu0 %v1039_v22 }
  0x4b   : > { %525 = vmatpush.bf16.msra.mxu0 %v1038_v23 }
  0x4f   : > { %526 = vmatpush.bf16.msra.mxu0 %v1037_v24 }
  0x53   : > { %527 = vmatpush.bf16.msra.mxu0 %v1036_v25 }
  0x57   : > { %528 = vmatpush.bf16.msra.mxu0 %v1035_v26 }
  0x5b   : > { %529 = vmatpush.bf16.msra.mxu0 %v1034_v27 }
  0x5f   : > { %530 = vmatpush.bf16.msra.mxu0 %v1033_v28 }
  0x62   : > { %531 = vmatmul.bf16.vlgmr.msra.gmra.mxu0 %v1032_v29 }
  0xdf   : > { %v532_v30 = vpop.f32.mrf.mxu0 }
  0xe0   : > { %538 = vst [vmem:[#allocation2] sm:$0xff] %v532_v30  ;;  %v551_v32 = vmul.f32 %v532_v30, %v532_v30 }
  0xe7   : > { %v534_v31 = vpop.f32.mrf.mxu0 }
  0xe8   : > { %539 = vst [vmem:[#allocation2 + $0x8] sm:$0xff] %v534_v31  ;;  %v541_v33 = vadd.f32 %v534_v31, %v532_v30  ;;  %v552_v34 = vmul.f32 %v534_v31, %v534_v31 }
  0xea   : > { %v542_v35 = vrot.slane %v541_v33, 4  ;;  %v553_v36 = vadd.f32 %v552_v34, %v551_v32 }
  0xec   : > { %v543_v37 = vadd.f32 %v542_v35, %v541_v33  ;;  %v554_v38 = vrot.slane %v553_v36, 4 }
  0xee   : > { %v544_v39 = vrot.slane %v543_v37, 2  ;;  %v555_v40 = vadd.f32 %v554_v38, %v553_v36 }
  0xf0   : > { %v545_v41 = vadd.f32 %v544_v39, %v543_v37  ;;  %v556_v42 = vrot.slane %v555_v40, 2 }
  0xf2   : > { %v546_v43 = vrot.slane %v545_v41, 1  ;;  %v557_v44 = vadd.f32 %v556_v42, %v555_v40 }
  0xf4   : > { %v547_v46 = vadd.f32 %v546_v43, %v545_v41  ;;  %v558_v47 = vrot.slane %v557_v44, 1 }
  0xf6   : > { %v548_v49 = vadd.f32 %v547_v46, %v540_v45  ;;  %v559_v50 = vadd.f32 %v558_v47, %v557_v44 }
  0xf8   : > { %549 = vst [vmem:[#allocation3] sm:$0x1] %v548_v49  ;;  %v560_v51 = vadd.f32 %v559_v50, %v550_v48 }
  0xfa   : > { %561 = vst [vmem:[#allocation4] sm:$0x1] %v560_v51 }
  0xfb PF: > { %p562_p11 = scmp.ge.s32.totalorder %s1140_s18, 1  ;;  %p563_p12 = scmp.lt.s32.totalorder %s1140_s18, 3 }
  0xfd   : > { %p564_p13 = pnand %p563_p12, %p562_p11 }
  0xff   : > { %567 = sbr.rel (%p564_p13) target bundleno = 446 (0x1be), region = 56 }
 0x104   : > { %v1048_v52 = vld [vmem:[%s1210_s29 + $0x38] sm:$0xff]  ;;  %v1047_v53 = vld [vmem:[%s1210_s29 + $0x30] sm:$0xff]  ;;  %v1046_v54 = vld [vmem:[%s1210_s29 + $0x28] sm:$0xff]  ;;  %v697_v7 = vlaneseq }
 0x105   : > { %650 = vmatpush.bf16.msra.mxu0 %v1048_v52  ;;  %v1045_v55 = vld [vmem:[%s1210_s29 + $0x20] sm:$0xff]  ;;  %v1090_v56 = vld [vmem:[#allocation5] ss:$0 sm:$0xff]  ;;  %v1044_v57 = vld [vmem:[%s1210_s29 + $0x18] sm:$0xff] }
 0x106   : > { %v569_v58 = vld [vmem:[#allocation2] sm:$0xff]  ;;  %v570_v59 = vld [vmem:[#allocation2 + $0x8] sm:$0xff]  ;;  %v1091_v62 = vld [vmem:[#allocation6] ss:$0 sm:$0xff]  ;;  %v698_v8 = vshrl.u32 %v697_v7, 7 }
 0x107   : > { %v575_v60 = vmul.f32 %v1090_v56, %v569_v58  ;;  %v576_v61 = vmul.f32 %v1090_v56, %v570_v59  ;;  %v1043_v63 = vld [vmem:[%s1210_s29 + $0x10] sm:$0xff]  ;;  %v1042_v2 = vld [vmem:[%s1210_s29 + $0x8] sm:$0xff]  ;;  %v1041_v5 = vld [vmem:[%s1210_s29] sm:$0xff] }
 0x108   : > { %v699_v10 = vadd.s32 8, %v698_v8  ;;  %v707_v26 = vld [vmem:[#allocation3] sm:$0x1]  ;;  %v717_v29 = vld [vmem:[#allocation4] sm:$0x1] }
 0x109   : > { %651 = vmatpush.bf16.msra.mxu0 %v1047_v53  ;;  %v581_v0 = vadd.f32 %v1091_v62, %v575_v60  ;;  %v582_v1 = vadd.f32 %v1091_v62, %v576_v61 }
 0x10a   : > { %vm704_vm3 = vcmp.lt.s32.totalorder %v699_v10, 10 }
 0x10b   : > { %v583_v3 = vmax.f32 %v581_v0, 0.0  ;;  %v584_v4 = vmax.f32 %v582_v1, 0.0 }
 0x10d   : > { %652 = vmatpush.bf16.msra.mxu0 %v1046_v54  ;;  %v585_v6 = vpack.c.bf16 %v584_v4, %v583_v3 }
 0x111   : > { %653 = vmatpush.bf16.msra.mxu0 %v1045_v55 }
 0x115   : > { %654 = vmatpush.bf16.msra.mxu0 %v1044_v57 }
 0x119   : > { %655 = vmatpush.bf16.msra.mxu0 %v1043_v63 }
 0x11d   : > { %656 = vmatpush.bf16.msra.mxu0 %v1042_v2 }
 0x121   : > { %657 = vmatpush.bf16.msra.mxu0 %v1041_v5 }
 0x124   : > { %658 = vmatmul.bf16.vlgmr.msra.gmra.mxu0 %v585_v6 }
 0x1a1   : > { %v659_v9 = vpop.f32.mrf.mxu0 }
 0x1a2   : > { %664 = vst [vmem:[#allocation2] sm:$0xff] %v659_v9  ;;  %v718_v13 = vmul.f32 %v659_v9, %v659_v9 }
 0x1a9   : > { %v661_v11 = vpop.f32.mrf.mxu0 }
 0x1aa   : > { %665 = vst [vmem:[#allocation2 + $0x8] sm:$0xff] %v661_v11  ;;  %v706_v12 = vsel %vm704_vm3, %v661_v11, 0.0 }
 0x1ab   : > { %v708_v14 = vadd.f32 %v706_v12, %v659_v9  ;;  %v719_v15 = vmul.f32 %v706_v12, %v706_v12 }
 0x1ad   : > { %v709_v16 = vrot.slane %v708_v14, 4  ;;  %v720_v17 = vadd.f32 %v719_v15, %v718_v13 }
 0x1af   : > { %v710_v18 = vadd.f32 %v709_v16, %v708_v14  ;;  %v721_v19 = vrot.slane %v720_v17, 4 }
 0x1b1   : > { %v711_v20 = vrot.slane %v710_v18, 2  ;;  %v722_v21 = vadd.f32 %v721_v19, %v720_v17 }
 0x1b3   : > { %v712_v22 = vadd.f32 %v711_v20, %v710_v18  ;;  %v723_v23 = vrot.slane %v722_v21, 2 }
 0x1b5   : > { %v713_v24 = vrot.slane %v712_v22, 1  ;;  %v724_v25 = vadd.f32 %v723_v23, %v722_v21 }
 0x1b7   : > { %v714_v27 = vadd.f32 %v713_v24, %v712_v22  ;;  %v725_v28 = vrot.slane %v724_v25, 1 }
 0x1b9   : > { %v715_v30 = vadd.f32 %v714_v27, %v707_v26  ;;  %v726_v31 = vadd.f32 %v725_v28, %v724_v25 }
 0x1bb   : > { %716 = vst [vmem:[#allocation3] sm:$0x1] %v715_v30  ;;  %v727_v32 = vadd.f32 %v726_v31, %v717_v29 }
 0x1bd   : > { %728 = vst [vmem:[#allocation4] sm:$0x1] %v727_v32 }
 0x1be PF: > { %p1008_p0 = scmp.ne.s32.totalorder %s1140_s18, 3 }
 0x1c0   : > { %732 = sbr.rel (%p1008_p0) target bundleno = 462 (0x1ce), region = 68 }
 0x1c5   : > { %v734_v33 = vld [vmem:[#allocation2] sm:$0xff]  ;;  %v1092_v34 = vld [vmem:[#allocation5] ss:$0 sm:$0xff]  ;;  %v1093_v35 = vld [vmem:[#allocation6] ss:$0 sm:$0xff] }
 0x1c6   : > { %v735_v36 = vld [vmem:[#allocation2 + $0x8] sm:$0xff]  ;;  %v740_v37 = vmul.f32 %v1092_v34, %v734_v33 }
 0x1c7   : > { %v741_v38 = vmul.f32 %v1092_v34, %v735_v36 }
 0x1c8   : > { %v746_v39 = vadd.f32 %v1093_v35, %v740_v37 }
 0x1c9   : > { %v747_v40 = vadd.f32 %v1093_v35, %v741_v38 }
 0x1ca   : > { %v748_v41 = vmax.f32 %v746_v39, 0.0 }
 0x1cb   : > { %v749_v42 = vmax.f32 %v747_v40, 0.0 }
 0x1cc   : > { %750 = vst [vmem:[#allocation7] sm:$0xff] %v748_v41 }
 0x1cd   : > { %751 = vst [vmem:[#allocation7 + $0x8] sm:$0xff] %v749_v42 }
 0x1ce PF: > { %p1057_p1 = scmp.eq.s32.totalorder %s876_s21, 3  ;;  %s769_s18 = sshll.u32 %s1280_s5, 4  ;;  %s770_s18 = int_to_ptr.hbm [resolvable:$true] %s769_s18 }
 0x1cf   : > { %s1151_s12 = smov [#allocation7]   ;;  %s1152_s14 = smov 128  }
 0x1d0   : > { %s767_s13 = sshll.u32 %s1151_s12, 4  ;;  %s1153_s15 = smov 8   ;;  %s768_s13 = int_to_ptr.vmem [resolvable:$true] %s767_s13 }
 0x1d1   : > { %1050 = dma.vmem_to_hbm [thread:$0]  (%p1057_p1), %s768_s13, 256, %s770_s18, [#allocation8], %s1152_s14, %s1152_s14, %s1153_s15  }
 0x1d2 PF: > { %p1058_p2 = scmp.ge.s32.totalorder %s1148_s20, 2  ;;  %p1059_p3 = scmp.eq.s32.totalorder %s877_s22, 3 }
 0x1d4   : > { %p1054_p4 = pnand %p1059_p3, %p1058_p2 }
 0x1d6   : > { %p1055_p5 = pneg %p1054_p4 }
 0x1d8   : > { %1135 = dma.done.wait (%p1055_p5), [#allocation8], 256  }
 0x1d9   : > { %1137 = vsyncadd (%p1055_p5), [#allocation8], 4294967040  ;;  %s18_s20 = sadd.s32 1, %s1148_s20   ;;  %s1281_s18 = smov %s1144_s19 }
 0x1da   : > { %p15_p6 = scmp.ge.s32.totalorder %s18_s20, 6   ;;  %s1282_s19 = smov %s1284_s23 }
 0x1dc   :  { %17 = sbr.rel (!%p15_p6) target bundleno = 3 (0x3), region = 115 }
 0x1e1   :  { %791 = vsyncpa [#allocation8], 1 }
 0x1e2   :  { %793 = vsyncpa [#allocation8 + $0x1], 1 }

</bundles_post_ra>
